<compile_context>
chip_gen: v5e
topology: v5e:2x2
jax: 0.10.0
libtpu: 0.0.40
codegen_flags: <defaults>
</compile_context>

<pallas_src>
import functools
import math

import numpy as np
import jax
import jax.numpy as jnp
from jax.experimental import pallas as pl
from jax.experimental.pallas import tpu as pltpu


# ----------------------------------------------------------------------------
# Pallas kernel: elementwise normalized-ReLU bounding over a [tile_r, L] block.
# ----------------------------------------------------------------------------
def _norm_relu_bounding_kernel(x_ref, thresh_ref, mask_ref, o_ref):
    # f32 math regardless of input dtype (matches PyTorch promotion; free here).
    x = x_ref[...].astype(jnp.float32)      # (tile_r, L)
    t = thresh_ref[...]                     # (1, L) f32 normalized min values
    m = mask_ref[...]                       # (1, L) f32, 1.0 where channel is bounded
    bounded = jnp.maximum(x - t, 0.0) + t   # relu(x - t) + t
    o_ref[...] = jnp.where(m != 0.0, bounded, x).astype(o_ref.dtype)


# ----------------------------------------------------------------------------
# Per-generation defaults.
# ----------------------------------------------------------------------------
@functools.lru_cache(maxsize=1)
def _device_config():
    """Returns (target_block_bytes, vmem_limit_bytes, has_two_tensorcores)."""
    kind = ""
    try:
        kind = jax.devices()[0].device_kind.lower()
    except Exception:
        pass
    # Conservative defaults (unknown device / interpret mode).
    target, limit, two_tc = 4 << 20, 32 << 20, False
    if "v7" in kind or "7x" in kind:
        target, limit, two_tc = 6 << 20, 32 << 20, True   # 64 MiB physical VMEM, 2 TCs
    elif "v6" in kind:
        target, limit = 8 << 20, 64 << 20                  # 128 MiB VMEM, ~1.4 TB/s HBM
    elif "v5" in kind:
        target, limit = 4 << 20, 64 << 20                  # 128 MiB VMEM, ~0.82 TB/s HBM
    try:  # refine against the actual VMEM capacity when queryable
        cap = int(pltpu.get_tpu_info().vmem_capacity_bytes)
        limit = min(limit, cap // 2)
    except Exception:
        pass
    return target, limit, two_tc


# ----------------------------------------------------------------------------
# Pallas wrapper over a lane-dense (R, L) view.
# ----------------------------------------------------------------------------
def _apply_bounding_2d(x2d, thresh_row, mask_row, *, donate=False,
                       target_block_bytes=None, vmem_limit_bytes=None):
    """x2d: (R, L) with L a multiple of 128 and of num_channels.
    thresh_row / mask_row: (1, L) float32.

    donate=True aliases the output onto x2d's HBM buffer.  Only pass it when the
    caller no longer uses x2d afterwards; otherwise XLA inserts a defensive
    full-tensor copy that doubles the cost of this bandwidth-bound op.
    """
    r, l = x2d.shape
    dev_target, dev_limit, two_tc = _device_config()
    if target_block_bytes is None:
        target_block_bytes = dev_target
    if vmem_limit_bytes is None:
        vmem_limit_bytes = dev_limit

    itemsize = np.dtype(x2d.dtype).itemsize
    # Sublane granule is dtype-dependent: 8 rows f32, 16 bf16/f16, 32 int8/fp8.
    sub = max(8, 32 // itemsize)
    lane_padded = pl.cdiv(l, 128) * 128
    row_vmem_bytes = lane_padded * itemsize

    # Real per-step VMEM footprint: input + output blocks, each double-buffered
    # (4x block bytes), plus the two constant (1, L) f32 rows (sublane-padded to
    # 8 rows, double-buffered) and some headroom.
    aux_bytes = 2 * 2 * 8 * lane_padded * 4
    headroom = 2 << 20
    budget = max(row_vmem_bytes, vmem_limit_bytes - aux_bytes - headroom)
    max_block_bytes = min(target_block_bytes, budget // 4)

    rows_target = max(1, max_block_bytes // row_vmem_bytes)
    if rows_target >= r:
        tile_r = r
        # On a 2-TensorCore chip never leave grid=(1,): split the single block so
        # the "parallel" axis can shard across cores.
        if two_tc and r >= 2 * sub:
            tile_r = min(r, pl.cdiv(pl.cdiv(r, 2), sub) * sub)
    else:
        tile_r = min(r, max(sub, (rows_target // sub) * sub))

    grid = (pl.cdiv(r, tile_r),)   # ragged trailing block is masked by Pallas

    return pl.pallas_call(
        _norm_relu_bounding_kernel,
        out_shape=jax.ShapeDtypeStruct((r, l), x2d.dtype),
        grid_spec=pltpu.PrefetchScalarGridSpec(
            num_scalar_prefetch=0,
            grid=grid,
            in_specs=[
                pl.BlockSpec((tile_r, l), lambda i: (i, 0)),
                pl.BlockSpec((1, l), lambda i: (0, 0)),   # threshold row (constant block)
                pl.BlockSpec((1, l), lambda i: (0, 0)),   # mask row (constant block)
            ],
            out_specs=pl.BlockSpec((tile_r, l), lambda i: (i, 0)),
        ),
        compiler_params=pltpu.CompilerParams(
            dimension_semantics=("parallel",),
            vmem_limit_bytes=int(vmem_limit_bytes),
        ),
        input_output_aliases=({0: 0} if donate else {}),
    )(x2d, thresh_row, mask_row)


# ----------------------------------------------------------------------------
# JAX-side "module": parameter setup mirroring NormalizedReluBounding.__init__.
# ----------------------------------------------------------------------------
class NormalizedReluBoundingJAX:
    def __init__(self, *, variables, name_to_index, min_val, normalizer,
                 statistics, name_to_index_stats, num_channels):
        if len(normalizer) != len(variables):
            raise ValueError("normalizer length must match variables")
        if len(min_val) != len(variables):
            raise ValueError("min_val length must match variables")
        if not all(n in {"mean-std", "min-max", "max", "std"} for n in normalizer):
            raise ValueError("invalid normalizer")

        self.num_channels = int(num_channels)
        self.data_index = np.array([name_to_index[v] for v in variables], dtype=np.int64)

        norm_min_val = np.zeros(len(variables), dtype=np.float32)
        for ii, var in enumerate(variables):
            si = name_to_index_stats[var]
            if normalizer[ii] == "mean-std":
                mean = statistics["mean"][si]
                std = statistics["stdev"][si]
                norm_min_val[ii] = (min_val[ii] - mean) / std
            elif normalizer[ii] == "min-max":
                mn = statistics["min"][si]
                mx = statistics["max"][si]
                norm_min_val[ii] = (min_val[ii] - mn) / (mx - mn)
            elif normalizer[ii] == "max":
                norm_min_val[ii] = min_val[ii] / statistics["max"][si]
            elif normalizer[ii] == "std":
                norm_min_val[ii] = min_val[ii] / statistics["stdev"][si]
        self.norm_min_val = norm_min_val

        # Scatter threshold / selection mask onto the full channel axis (once).
        thresh_c = np.zeros((self.num_channels,), dtype=np.float32)
        mask_c = np.zeros((self.num_channels,), dtype=np.float32)
        thresh_c[self.data_index] = norm_min_val
        mask_c[self.data_index] = 1.0
        self._thresh_c_np = thresh_c
        self._mask_c_np = mask_c
        self._thresh_c = jnp.asarray(thresh_c)   # (C,) f32, for the tiny jnp path
        self._mask_c = jnp.asarray(mask_c)
        self._row_cache = {}                     # L -> ((1, L) thresh, (1, L) mask), f32

    def _rows(self, l: int):
        if l not in self._row_cache:
            reps = l // self.num_channels
            self._row_cache[l] = (
                jnp.asarray(np.tile(self._thresh_c_np, reps)[None, :]),
                jnp.asarray(np.tile(self._mask_c_np, reps)[None, :]),
            )
        return self._row_cache[l]

    def _bound_jnp(self, flat: jax.Array) -> jax.Array:
        """Plain-XLA path for tiny remainders (length is a multiple of C)."""
        x2 = flat.reshape(-1, self.num_channels).astype(jnp.float32)
        bounded = jnp.maximum(x2 - self._thresh_c, 0.0) + self._thresh_c
        out = jnp.where(self._mask_c != 0.0, bounded, x2).astype(flat.dtype)
        return out.reshape(flat.shape)

    def __call__(self, x: jax.Array, *, donate: bool = False,
                 target_block_bytes: int | None = None) -> jax.Array:
        """Applies the bounding.  Pass donate=True only if `x` is not used after
        this call (then the output reuses x's HBM buffer; otherwise XLA would add
        a defensive copy).

        TODO(synk): the PyTorch forward mutates x in place; here a new array is
        returned (functional semantics), with optional buffer donation.
        """
        orig_shape = x.shape
        c = orig_shape[-1]
        assert c == self.num_channels
        total = int(x.size)
        base = math.lcm(c, 128)   # smallest lane-dense row length

        if total % base == 0:
            # Lane-dense path: exact reshape, no padding, no extra HBM pass.
            l = base
            while l * 2 <= 4096 and total % (l * 2) == 0:
                l *= 2
            t_row, m_row = self._rows(l)
            out2d = _apply_bounding_2d(x.reshape(-1, l), t_row, m_row,
                                       donate=donate,
                                       target_block_bytes=target_block_bytes)
            return out2d.reshape(orig_shape)

        # Ragged case: run the kernel on the lane-dense divisible prefix and the
        # (< lcm(C,128) element) remainder with plain jnp.  Never emit a
        # BlockSpec whose lane dim is C.
        l = base
        n_main = (total // l) * l            # multiple of C -> channel phase preserved
        x_flat = x.reshape(-1)
        if n_main == 0:
            # Whole tensor smaller than one lane-dense row: pure jnp.
            return self._bound_jnp(x_flat).reshape(orig_shape)
        t_row, m_row = self._rows(l)
        out_main = _apply_bounding_2d(x_flat[:n_main].reshape(-1, l), t_row, m_row,
                                      donate=False,
                                      target_block_bytes=target_block_bytes)
        out_tail = self._bound_jnp(x_flat[n_main:])
        return jnp.concatenate([out_main.reshape(-1), out_tail]).reshape(orig_shape)


# ----------------------------------------------------------------------------
# Pure-JAX reference for verification.
# ----------------------------------------------------------------------------
def reference(x, data_index, norm_min_val):
    sel = x[..., data_index]
    bounded = jnp.maximum(sel - norm_min_val, 0.0) + norm_min_val
    return x.at[..., data_index].set(bounded)


if __name__ == "__main__":
    # Deterministic small example: bound 3 of 8 variables.
    num_channels = 8
    variables = ["tp", "swe", "q"]
    name_to_index = {f"var{i}": i for i in range(num_channels)}
    name_to_index.update({"tp": 1, "swe": 4, "q": 6})
    name_to_index_stats = dict(name_to_index)

    rng = np.random.RandomState(0)
    statistics = {
        "mean": rng.uniform(-1.0, 1.0, size=num_channels).astype(np.float32),
        "stdev": rng.uniform(0.5, 2.0, size=num_channels).astype(np.float32),
        "min": rng.uniform(-5.0, -1.0, size=num_channels).astype(np.float32),
        "max": rng.uniform(1.0, 5.0, size=num_channels).astype(np.float32),
    }
    min_val = [0.0, 0.1, -0.2]
    normalizer = ["mean-std", "min-max", "std"]

    bounding = NormalizedReluBoundingJAX(
        variables=variables,
        name_to_index=name_to_index,
        min_val=min_val,
        normalizer=normalizer,
        statistics=statistics,
        name_to_index_stats=name_to_index_stats,
        num_channels=num_channels,
    )
    data_index = jnp.asarray(bounding.data_index)
    norm_min_val = jnp.asarray(bounding.norm_min_val)

    key = jax.random.PRNGKey(0)
    k1, k2, k3, k4, k5 = jax.random.split(key, 5)

    # 1) Main lane-dense path (total divisible by lcm(C, 128)), single block.
    x1 = jax.random.normal(k1, (2, 16, num_channels), dtype=jnp.float32)
    ref1 = jax.block_until_ready(reference(x1, data_index, norm_min_val))
    out1 = jax.block_until_ready(bounding(x1))
    np.testing.assert_allclose(np.asarray(out1), np.asarray(ref1), rtol=1e-6, atol=1e-6)

    # 2) Tiny tensor (< one lane-dense row): pure jnp remainder path.
    x2 = jax.random.normal(k2, (3, 5, num_channels), dtype=jnp.float32)
    ref2 = jax.block_until_ready(reference(x2, data_index, norm_min_val))
    out2 = jax.block_until_ready(bounding(x2))
    np.testing.assert_allclose(np.asarray(out2), np.asarray(ref2), rtol=1e-6, atol=1e-6)

    # 3) Multi-block grid with a ragged trailing block (R=13, tile_r=8 -> grid 2).
    x3 = jax.random.normal(k3, (4, 52, num_channels), dtype=jnp.float32)
    ref3 = jax.block_until_ready(reference(x3, data_index, norm_min_val))
    out3 = jax.block_until_ready(bounding(x3, target_block_bytes=4096))
    np.testing.assert_allclose(np.asarray(out3), np.asarray(ref3), rtol=1e-6, atol=1e-6)

    # 4) Ragged total (kernel on lane-dense prefix + jnp tail, no L=C BlockSpec).
    x4 = jax.random.normal(k4, (3, 7, num_channels), dtype=jnp.float32)
    ref4 = jax.block_until_ready(reference(x4, data_index, norm_min_val))
    out4 = jax.block_until_ready(bounding(x4))
    np.testing.assert_allclose(np.asarray(out4), np.asarray(ref4), rtol=1e-6, atol=1e-6)

    # 5) bf16 input: kernel computes in f32 and casts on store.
    x5 = jax.random.normal(k5, (2, 64, num_channels), dtype=jnp.bfloat16)
    ref5 = reference(x5.astype(jnp.float32), data_index, norm_min_val).astype(jnp.bfloat16)
    ref5 = jax.block_until_ready(ref5)
    out5 = jax.block_until_ready(bounding(x5))
    np.testing.assert_allclose(np.asarray(out5, dtype=np.float32),
                               np.asarray(ref5, dtype=np.float32), rtol=1e-2, atol=1e-2)

    # 6) Opt-in donation: buffer not used afterwards -> output may alias input HBM.
    x1d = jnp.copy(x1)
    out6 = jax.block_until_ready(bounding(x1d, donate=True))
    np.testing.assert_allclose(np.asarray(out6), np.asarray(ref1), rtol=1e-6, atol=1e-6)

    print("KERNEL_OK")
</pallas_src>

<mosaic_0001>
module attributes {stable_mosaic.version = 11 : i64} {
  func.func @_norm_relu_bounding_kernel(%arg0: i32, %arg1: memref<1x256xf32, #tpu.memory_space<vmem>>, %arg2: memref<1x256xf32, #tpu.memory_space<vmem>>, %arg3: memref<1x256xf32, #tpu.memory_space<vmem>>, %arg4: memref<1x256xf32, #tpu.memory_space<vmem>>) attributes {dimension_semantics = [#tpu.dimension_semantics<parallel>], iteration_bounds = array<i64: 1>, scalar_prefetch = 0 : i64, scratch_operands = 0 : i64, tpu.core_type = #tpu.core_type<tc>, window_params = [{transform_indices = @transform_0, window_bounds = array<i64: 1, 256>}, {pipeline_mode = #tpu.pipeline_mode<synchronous>, transform_indices = @transform_1, window_bounds = array<i64: 1, 256>}, {pipeline_mode = #tpu.pipeline_mode<synchronous>, transform_indices = @transform_2, window_bounds = array<i64: 1, 256>}, {transform_indices = @transform_3, window_bounds = array<i64: 1, 256>}]} {
    %c0 = arith.constant 0 : index
    %c0_0 = arith.constant 0 : index
    %0 = vector.load %arg1[%c0, %c0_0] : memref<1x256xf32, #tpu.memory_space<vmem>>, vector<1x256xf32>
    %c0_1 = arith.constant 0 : index
    %c0_2 = arith.constant 0 : index
    %1 = vector.load %arg2[%c0_1, %c0_2] : memref<1x256xf32, #tpu.memory_space<vmem>>, vector<1x256xf32>
    %c0_3 = arith.constant 0 : index
    %c0_4 = arith.constant 0 : index
    %2 = vector.load %arg3[%c0_3, %c0_4] : memref<1x256xf32, #tpu.memory_space<vmem>>, vector<1x256xf32>
    %3 = arith.subf %0, %1 : vector<1x256xf32>
    %cst = arith.constant 0.000000e+00 : f32
    %4 = vector.broadcast %cst : f32 to vector<1x256xf32>
    %5 = arith.maximumf %3, %4 : vector<1x256xf32>
    %6 = arith.addf %5, %1 : vector<1x256xf32>
    %cst_5 = arith.constant 0.000000e+00 : f32
    %7 = vector.broadcast %cst_5 : f32 to vector<1x256xf32>
    %8 = arith.cmpf one, %2, %7 : vector<1x256xf32>
    %9 = arith.select %8, %6, %0 : vector<1x256xi1>, vector<1x256xf32>
    %c0_6 = arith.constant 0 : index
    %c0_7 = arith.constant 0 : index
    %10 = vector.load %arg4[%c0_6, %c0_7] : memref<1x256xf32, #tpu.memory_space<vmem>>, vector<1x256xf32>
    tpu.vector_store %arg4[%c0_6, %c0_7], %9 {strides = array<i32>} : memref<1x256xf32, #tpu.memory_space<vmem>>, vector<1x256xf32>,
    return
  }
  func.func @transform_0(%arg0: i32) -> (i32, i32) {
    %c0_i32 = arith.constant 0 : i32
    %c0_i32_0 = arith.constant 0 : i32
    return %arg0, %c0_i32 : i32, i32
  }
  func.func @transform_1(%arg0: i32) -> (i32, i32) {
    %c0_i32 = arith.constant 0 : i32
    %c0_i32_0 = arith.constant 0 : i32
    %c0_i32_1 = arith.constant 0 : i32
    return %c0_i32, %c0_i32_0 : i32, i32
  }
  func.func @transform_2(%arg0: i32) -> (i32, i32) {
    %c0_i32 = arith.constant 0 : i32
    %c0_i32_0 = arith.constant 0 : i32
    %c0_i32_1 = arith.constant 0 : i32
    return %c0_i32, %c0_i32_0 : i32, i32
  }
  func.func @transform_3(%arg0: i32) -> (i32, i32) {
    %c0_i32 = arith.constant 0 : i32
    %c0_i32_0 = arith.constant 0 : i32
    return %arg0, %c0_i32 : i32, i32
  }
}

</mosaic_0001>

<bundles_post_ra>
// kernel: tpu_custom_call.1
= control target key start
LH: loop header
LB: loop body
LE: loop exit
PB: predicated region body
PF: predicated region fallthrough
CT: control target
= control target key end

     0   :  { %8 = vsyncpa [#allocation3], 0  ;;  %s229_s0 = inlined_call_operand.hbm [shape: f32[1,256], index: 0, kind: input, shape index: {}]   ;;  %s230_s1 = inlined_call_operand.hbm [shape: f32[1,256], index: 1, kind: input, shape index: {}]   ;;  %s231_s2 = inlined_call_operand.hbm [shape: f32[1,256], index: 2, kind: input, shape index: {}]   ;;  %s232_s3 = inlined_call_operand.hbm [shape: f32[1,256], index: 3, kind: output, shape index: {}]  }
   0x1   :  { %9 = vsyncpa [#allocation6], 0  ;;  %s27_s14 = sshll.u32 %s230_s1, 4  ;;  %s28_s14 = int_to_ptr.hbm [resolvable:$true] %s27_s14 }
   0x2   :  { %10 = vsyncpa [#allocation4], 0  ;;  %s193_s15 = smov [#allocation5]   ;;  %s16_s19 = sshll.u32 %s229_s0, 4  ;;  %s17_s19 = int_to_ptr.hbm [resolvable:$true] %s16_s19 }
   0x3   :  { %s29_s16 = sshll.u32 %s193_s15, 4  ;;  %s194_s20 = smov [#allocation2]   ;;  %s30_s16 = int_to_ptr.vmem [resolvable:$true] %s29_s16 }
   0x4   :  { %32 = dma.hbm_to_vmem [thread:$0]  %s28_s14, 32, %s30_s16, [#allocation6]  }
   0x5   :  { %s18_s21 = sshll.u32 %s194_s20, 4  ;;  %s38_s24 = sshll.u32 %s231_s2, 4  ;;  %s19_s21 = int_to_ptr.vmem [resolvable:$true] %s18_s21  ;;  %s39_s24 = int_to_ptr.hbm [resolvable:$true] %s38_s24 }
   0x6   :  { %21 = dma.hbm_to_vmem [thread:$0]  %s17_s19, 32, %s19_s21, [#allocation3]  }
   0x7   :  { %s195_s1 = smov [#allocation7]  }
   0x8   :  { %s40_s25 = sshll.u32 %s195_s1, 4  ;;  %s41_s25 = int_to_ptr.vmem [resolvable:$true] %s40_s25 }
   0x9   :  { %43 = dma.hbm_to_vmem [thread:$0]  %s39_s24, 32, %s41_s25, [#allocation6]  }
   0xa   :  { %187 = dma.done.wait [#allocation3], 32  }
   0xb   :  { %188 = vsyncadd [#allocation3], 4294967264 }
   0xc   :  { %189 = dma.done.wait [#allocation6], 64  }
   0xd   :  { %190 = vsyncadd [#allocation6], 4294967232  ;;  %v56_v0 = vld [vmem:[#allocation2] sm:$0x3]  ;;  %v57_v1 = vld [vmem:[#allocation5] sm:$0x3]  ;;  %v64_v4 = vlaneseq }
   0xe   :  { %v58_v2 = vld [vmem:[#allocation7] sm:$0x3]  ;;  %v59_v3 = vsub.f32 %v56_v0, %v57_v1  ;;  %s196_s0 = smov [#allocation8]   ;;  %s76_s28 = sshll.u32 %s232_s3, 4  ;;  %s77_s28 = int_to_ptr.hbm [resolvable:$true] %s76_s28 }
   0xf   :  { %s74_s26 = sshll.u32 %s196_s0, 4  ;;  %vm62_vm0 = vcmp.ne.f32.partialorder %v58_v2, 0.0  ;;  %vm66_vm1 = vcmp.lt.s32.totalorder %v64_v4, 256  ;;  %s75_s26 = int_to_ptr.vmem [resolvable:$true] %s74_s26 }
  0x10   :  { %v60_v5 = vmax.f32 %v59_v3, 0.0 }
  0x12   :  { %v61_v6 = vadd.f32 %v60_v5, %v57_v1 }
  0x14   :  { %v63_v7 = vsel %vm62_vm0, %v61_v6, %v56_v0 }
  0x15   :  { %68 = vst.msk [vmem:[#allocation8] sm:$0x3] %vm66_vm1, %v63_v7 }
  0x16   :  { %79 = dma.vmem_to_hbm [thread:$0]  %s75_s26, 32, %s77_s28, [#allocation4]  }
  0x17   :  { %191 = dma.done.wait [#allocation4], 32  }
  0x18   :  { %192 = vsyncadd [#allocation4], 4294967264 }
  0x19   :  { %84 = vsyncpa [#allocation3], 1 }
  0x1a   :  { %85 = vsyncpa [#allocation6], 1 }
  0x1b   :  { %86 = vsyncpa [#allocation4], 1 }

</bundles_post_ra>
